<compile_context>
chip_gen: v7x
topology: tpu7x:2x2x1
jax: 0.10.0
libtpu: 0.0.40
codegen_flags: <defaults>
</compile_context>

<pallas_src>
import jax
import jax.numpy as jnp
from jax.experimental import pallas as pl
from jax.experimental.pallas import tpu as pltpu


def _round_up(x, m):
    return (x + m - 1) // m * m


def _pick_tile_m(n):
    """Largest destination-node tile that divides N (multiple of 8, <= 512)."""
    for cand in (512, 256, 128, 64, 32, 16, 8):
        if n % cand == 0:
            return cand
    return n  # small / odd N: use the full extent (equals the array dim)


def _rgcn_layer_kernel(a_ref, h_ref, w_ref, deg_ref, b_ref, o_ref):
    """One RelGraphConv layer.

    Grid = (dst-node tiles [parallel], relations [arbitrary, reduction]).
    The output block (float32) is resident across the relation axis and is the
    accumulator; the deg/bias/relu epilogue runs in-place on the last relation.
    """
    r = pl.program_id(1)

    @pl.when(r == 0)
    def _():
        o_ref[...] = jnp.zeros_like(o_ref)

    # Per-relation node transform: [N, D] @ [D, D] -> [N, D]  (bf16 MXU, f32 acc)
    hw = jnp.dot(h_ref[...], w_ref[...], preferred_element_type=jnp.float32)
    # Aggregate messages from relation-r neighbors into this dst tile:
    #   [TM, N] @ [N, D] -> [TM, D].  A is 0/1 int8; the bf16 cast is exact.
    a = a_ref[...].astype(jnp.bfloat16)
    o_ref[...] += jnp.dot(a, hw.astype(jnp.bfloat16),
                          preferred_element_type=jnp.float32)

    @pl.when(r == pl.num_programs(1) - 1)
    def _():
        agg = o_ref[...] * deg_ref[...]                   # 'mean' aggregation
        o_ref[...] = jnp.maximum(agg + b_ref[...], 0.0)   # bias + relu


def rgcn_layer(A_i8, H_bf16, W_bf16, deg_inv, bias, *, tile_m):
    R, N, _ = A_i8.shape
    D = H_bf16.shape[1]
    grid = (N // tile_m, R)
    return pl.pallas_call(
        _rgcn_layer_kernel,
        out_shape=jax.ShapeDtypeStruct((N, D), jnp.float32),
        grid_spec=pltpu.PrefetchScalarGridSpec(
            num_scalar_prefetch=0,
            grid=grid,
            in_specs=[
                # A_r dst-tile: (TM, N) int8, streamed per (i, r).
                pl.BlockSpec((pl.Squeezed(), tile_m, N), lambda i, r: (r, i, 0)),
                # H: (N, D) bf16, resident across the whole grid.
                pl.BlockSpec((N, D), lambda i, r: (0, 0)),
                # W_r: (D, D) bf16, streamed per relation.
                pl.BlockSpec((pl.Squeezed(), D, D), lambda i, r: (r, 0, 0)),
                # 1/deg for this dst tile: (TM, 1) f32.
                pl.BlockSpec((tile_m, 1), lambda i, r: (i, 0)),
                # bias: (1, D) f32, resident.
                pl.BlockSpec((1, D), lambda i, r: (0, 0)),
            ],
            out_specs=pl.BlockSpec((tile_m, D), lambda i, r: (i, 0)),
        ),
        compiler_params=pltpu.CompilerParams(
            dimension_semantics=("parallel", "arbitrary"),
            vmem_limit_bytes=64 * 1024 * 1024,
        ),
    )(A_i8, H_bf16, W_bf16, deg_inv, bias)


def rgcn_forward(H, A, weights, biases, skip=False):
    """Full RGCN.forward: apply `numlayers` RelGraphConv layers sequentially."""
    R, N, _ = A.shape
    D = H.shape[1]
    D_pad = _round_up(D, 128)       # lane-dense hidden dim
    tile_m = _pick_tile_m(N)

    # In-degree of each destination node over all relations (glue, plain JAX).
    A_f = A.astype(jnp.float32)
    deg = jnp.sum(A_f, axis=(0, 2))                                          # [N]
    deg_inv = jnp.where(deg > 0, 1.0 / jnp.maximum(deg, 1.0), 0.0)[:, None]  # [N,1]
    deg_inv = deg_inv.astype(jnp.float32)

    # A is 0/1 -> store as int8: 4x less HBM traffic than f32, exact values.
    A_i8 = A.astype(jnp.int8)

    # Zero-pad the feature dim to a multiple of 128; padded lanes stay exactly
    # zero through every layer (zero W rows/cols, zero bias, relu(0)=0).
    h = jnp.pad(H.astype(jnp.float32), ((0, 0), (0, D_pad - D)))

    for W, b in zip(weights, biases):
        Wp = jnp.pad(W, ((0, 0), (0, D_pad - D), (0, D_pad - D)))
        bp = jnp.pad(b, ((0, 0), (0, D_pad - D))).astype(jnp.float32)
        h_new = rgcn_layer(A_i8,
                           h.astype(jnp.bfloat16),
                           Wp.astype(jnp.bfloat16),
                           deg_inv, bp, tile_m=tile_m)
        if skip:
            h_new = (h_new + h) / 2.0
        h = h_new
        # dropout=0 -> identity; dropout_mask buffer is all-ones -> identity.
    return h[:, :D]


def _rgcn_reference(H, A, weights, biases, skip=False):
    """Pure-JAX float32 reference of the same forward pass."""
    A_f = A.astype(jnp.float32)
    deg = jnp.sum(A_f, axis=(0, 2))
    deg_inv = jnp.where(deg > 0, 1.0 / jnp.maximum(deg, 1.0), 0.0)[:, None]
    h = H.astype(jnp.float32)
    R = A.shape[0]
    for W, b in zip(weights, biases):
        agg = sum(A_f[r] @ (h @ W[r]) for r in range(R))
        h_new = jnp.maximum(agg * deg_inv + b, 0.0)
        if skip:
            h_new = (h_new + h) / 2.0
        h = h_new
    return h


def init_rgcn_params(key, hdim, numlayers, num_rels):
    """Deterministic synthetic parameter init (xavier-ish), one set per layer."""
    weights, biases = [], []
    scale = 1.0 / jnp.sqrt(jnp.float32(hdim))
    for _ in range(numlayers):
        kw, kb, key = jax.random.split(key, 3)
        W = jax.random.normal(kw, (num_rels, hdim, hdim), jnp.float32) * scale
        b = 0.1 * jax.random.normal(kb, (1, hdim), jnp.float32)
        weights.append(W)
        biases.append(b)
    return weights, biases


if __name__ == "__main__":
    # Small, deterministic example consistent with RGCN's forward:
    # a graph with N nodes, R relation types, per-layer per-relation weights.
    hdim = 32
    numlayers = 2
    num_rels = 8
    N = 128      # batch of nodes (lane-friendly)
    E = 512      # number of edges (avg in-degree 4)

    key = jax.random.PRNGKey(0)
    k_h, k_src, k_dst, k_rel, k_par = jax.random.split(key, 5)

    # g.ndata['h'] : node features [N, hdim]
    H = jax.random.normal(k_h, (N, hdim), jnp.float32)

    # g.edges / g.edata['id'] : random edges with relation ids, densified to
    # A[r, dst, src] = 1.0
    src = jax.random.randint(k_src, (E,), 0, N)
    dst = jax.random.randint(k_dst, (E,), 0, N)
    rel = jax.random.randint(k_rel, (E,), 0, num_rels)
    A = jnp.zeros((num_rels, N, N), jnp.float32).at[rel, dst, src].add(1.0)
    A = jnp.minimum(A, 1.0)  # treat duplicate (src,dst,rel) edges as one

    weights, biases = init_rgcn_params(k_par, hdim, numlayers, num_rels)

    out = rgcn_forward(H, A, weights, biases, skip=False)
    out = jax.block_until_ready(out)
    assert out.shape == (N, hdim)
    assert jnp.all(jnp.isfinite(out))

    # Validate against the float32 reference (bf16 matmul inputs -> loose tol).
    ref = _rgcn_reference(H, A, weights, biases, skip=False)
    max_err = float(jnp.max(jnp.abs(out - ref)))
    tol = 5e-2 + 5e-2 * float(jnp.max(jnp.abs(ref)))
    assert max_err < tol, f"max abs err {max_err} exceeds tol {tol}"

    print("KERNEL_OK")
</pallas_src>

<mosaic_0001>
module attributes {stable_mosaic.version = 11 : i64} {
  func.func @_rgcn_layer_kernel(%arg0: i32, %arg1: i32, %arg2: memref<1x128x128xi8, #tpu.memory_space<vmem>>, %arg3: memref<128x128xbf16, #tpu.memory_space<vmem>>, %arg4: memref<1x128x128xbf16, #tpu.memory_space<vmem>>, %arg5: memref<128x1xf32, #tpu.memory_space<vmem>>, %arg6: memref<1x128xf32, #tpu.memory_space<vmem>>, %arg7: memref<128x128xf32, #tpu.memory_space<vmem>>) attributes {dimension_semantics = [#tpu.dimension_semantics<parallel>, #tpu.dimension_semantics<arbitrary>], iteration_bounds = array<i64: 1, 8>, scalar_prefetch = 0 : i64, scratch_operands = 0 : i64, tpu.core_type = #tpu.core_type<tc>, window_params = [{transform_indices = @transform_0, window_bounds = array<i64: 1, 128, 128>}, {pipeline_mode = #tpu.pipeline_mode<synchronous>, transform_indices = @transform_1, window_bounds = array<i64: 128, 128>}, {transform_indices = @transform_2, window_bounds = array<i64: 1, 128, 128>}, {transform_indices = @transform_3, window_bounds = array<i64: 128, 1>}, {pipeline_mode = #tpu.pipeline_mode<synchronous>, transform_indices = @transform_4, window_bounds = array<i64: 1, 128>}, {transform_indices = @transform_5, window_bounds = array<i64: 128, 128>}]} {
    %c0_i32 = arith.constant 0 : i32
    %0 = arith.cmpi eq, %arg1, %c0_i32 : i32
    %1 = arith.extui %0 : i1 to i32
    %c0_i32_0 = arith.constant 0 : i32
    %2 = arith.cmpi ne, %1, %c0_i32_0 : i32
    scf.if %2 {
      %cst_14 = arith.constant 0.000000e+00 : f32
      %18 = vector.broadcast %cst_14 : f32 to vector<128x128xf32>
      %c0_15 = arith.constant 0 : index
      %c0_16 = arith.constant 0 : index
      %19 = vector.load %arg7[%c0_15, %c0_16] : memref<128x128xf32, #tpu.memory_space<vmem>>, vector<128x128xf32>
      tpu.vector_store %arg7[%c0_15, %c0_16], %18 {strides = array<i32>} : memref<128x128xf32, #tpu.memory_space<vmem>>, vector<128x128xf32>,
    } else {
    }
    %c0 = arith.constant 0 : index
    %c0_1 = arith.constant 0 : index
    %3 = vector.load %arg3[%c0, %c0_1] : memref<128x128xbf16, #tpu.memory_space<vmem>>, vector<128x128xbf16>
    %c0_2 = arith.constant 0 : index
    %c0_3 = arith.constant 0 : index
    %c0_4 = arith.constant 0 : index
    %4 = vector.load %arg4[%c0_2, %c0_3, %c0_4] : memref<1x128x128xbf16, #tpu.memory_space<vmem>>, vector<1x128x128xbf16>
    %5 = vector.shape_cast %4 : vector<1x128x128xbf16> to vector<128x128xbf16>
    %cst = arith.constant dense<0.000000e+00> : vector<128x128xf32>
    %6 = tpu.matmul %3, %5, %cst {dimension_numbers = #tpu.dot_dimension_numbers<[1], [0], [0], [1], [0, 0, 1, 1], [], []>} : vector<128x128xbf16>, vector<128x128xbf16>, vector<128x128xf32> -> vector<128x128xf32>
    %c0_5 = arith.constant 0 : index
    %c0_6 = arith.constant 0 : index
    %c0_7 = arith.constant 0 : index
    %7 = vector.load %arg2[%c0_5, %c0_6, %c0_7] : memref<1x128x128xi8, #tpu.memory_space<vmem>>, vector<1x128x128xi8>
    %8 = vector.shape_cast %7 : vector<1x128x128xi8> to vector<128x128xi8>
    %9 = arith.sitofp %8 : vector<128x128xi8> to vector<128x128xbf16>
    %c0_8 = arith.constant 0 : index
    %c0_9 = arith.constant 0 : index
    %10 = vector.load %arg7[%c0_8, %c0_9] : memref<128x128xf32, #tpu.memory_space<vmem>>, vector<128x128xf32>
    %11 = arith.truncf %6 : vector<128x128xf32> to vector<128x128xbf16>
    %cst_10 = arith.constant dense<0.000000e+00> : vector<128x128xf32>
    %12 = tpu.matmul %9, %11, %cst_10 {dimension_numbers = #tpu.dot_dimension_numbers<[1], [0], [0], [1], [0, 0, 1, 1], [], []>} : vector<128x128xbf16>, vector<128x128xbf16>, vector<128x128xf32> -> vector<128x128xf32>
    %13 = arith.addf %10, %12 : vector<128x128xf32>
    %c0_11 = arith.constant 0 : index
    %c0_12 = arith.constant 0 : index
    %14 = vector.load %arg7[%c0_11, %c0_12] : memref<128x128xf32, #tpu.memory_space<vmem>>, vector<128x128xf32>
    tpu.vector_store %arg7[%c0_11, %c0_12], %13 {strides = array<i32>} : memref<128x128xf32, #tpu.memory_space<vmem>>, vector<128x128xf32>,
    %c7_i32 = arith.constant 7 : i32
    %15 = arith.cmpi eq, %arg1, %c7_i32 : i32
    %16 = arith.extui %15 : i1 to i32
    %c0_i32_13 = arith.constant 0 : i32
    %17 = arith.cmpi ne, %16, %c0_i32_13 : i32
    scf.if %17 {
      %c0_14 = arith.constant 0 : index
      %c0_15 = arith.constant 0 : index
      %18 = vector.load %arg7[%c0_14, %c0_15] : memref<128x128xf32, #tpu.memory_space<vmem>>, vector<128x128xf32>
      %c0_16 = arith.constant 0 : index
      %c0_17 = arith.constant 0 : index
      %19 = vector.load %arg5[%c0_16, %c0_17] : memref<128x1xf32, #tpu.memory_space<vmem>>, vector<128x1xf32>
      %20 = vector.broadcast %19 : vector<128x1xf32> to vector<128x128xf32>
      %21 = arith.mulf %18, %20 : vector<128x128xf32>
      %c0_18 = arith.constant 0 : index
      %c0_19 = arith.constant 0 : index
      %22 = vector.load %arg6[%c0_18, %c0_19] : memref<1x128xf32, #tpu.memory_space<vmem>>, vector<1x128xf32>
      %23 = vector.broadcast %22 : vector<1x128xf32> to vector<128x128xf32>
      %24 = arith.addf %21, %23 : vector<128x128xf32>
      %cst_20 = arith.constant 0.000000e+00 : f32
      %25 = vector.broadcast %cst_20 : f32 to vector<128x128xf32>
      %26 = arith.maximumf %24, %25 : vector<128x128xf32>
      %c0_21 = arith.constant 0 : index
      %c0_22 = arith.constant 0 : index
      %27 = vector.load %arg7[%c0_21, %c0_22] : memref<128x128xf32, #tpu.memory_space<vmem>>, vector<128x128xf32>
      tpu.vector_store %arg7[%c0_21, %c0_22], %26 {strides = array<i32>} : memref<128x128xf32, #tpu.memory_space<vmem>>, vector<128x128xf32>,
    } else {
    }
    return
  }
  func.func @transform_0(%arg0: i32, %arg1: i32) -> (i32, i32, i32) {
    %c0_i32 = arith.constant 0 : i32
    %c0_i32_0 = arith.constant 0 : i32
    return %arg1, %arg0, %c0_i32 : i32, i32, i32
  }
  func.func @transform_1(%arg0: i32, %arg1: i32) -> (i32, i32) {
    %c0_i32 = arith.constant 0 : i32
    %c0_i32_0 = arith.constant 0 : i32
    %c0_i32_1 = arith.constant 0 : i32
    return %c0_i32, %c0_i32_0 : i32, i32
  }
  func.func @transform_2(%arg0: i32, %arg1: i32) -> (i32, i32, i32) {
    %c0_i32 = arith.constant 0 : i32
    %c0_i32_0 = arith.constant 0 : i32
    %c0_i32_1 = arith.constant 0 : i32
    return %arg1, %c0_i32, %c0_i32_0 : i32, i32, i32
  }
  func.func @transform_3(%arg0: i32, %arg1: i32) -> (i32, i32) {
    %c0_i32 = arith.constant 0 : i32
    %c0_i32_0 = arith.constant 0 : i32
    return %arg0, %c0_i32 : i32, i32
  }
  func.func @transform_4(%arg0: i32, %arg1: i32) -> (i32, i32) {
    %c0_i32 = arith.constant 0 : i32
    %c0_i32_0 = arith.constant 0 : i32
    %c0_i32_1 = arith.constant 0 : i32
    return %c0_i32, %c0_i32_0 : i32, i32
  }
  func.func @transform_5(%arg0: i32, %arg1: i32) -> (i32, i32) {
    %c0_i32 = arith.constant 0 : i32
    %c0_i32_0 = arith.constant 0 : i32
    return %arg0, %c0_i32 : i32, i32
  }
}

</mosaic_0001>

<bundles_post_ra>
// kernel: tpu_custom_call.1
= control target key start
LH: loop header
LB: loop body
LE: loop exit
PB: predicated region body
PF: predicated region fallthrough
CT: control target
= control target key end

     0   :  { %s1935_s0 = inlined_call_operand.hbm [shape: s8[8,128,128], index: 0, kind: input, shape index: {}]   ;;  %s1936_s1 = inlined_call_operand.hbm [shape: bf16[128,128], index: 1, kind: input, shape index: {}]   ;;  %s1937_s2 = inlined_call_operand.hbm [shape: bf16[8,128,128], index: 2, kind: input, shape index: {}]   ;;  %s1938_s3 = inlined_call_operand.hbm [shape: f32[128,1], index: 3, kind: input, shape index: {}]   ;;  %s1939_s4 = inlined_call_operand.hbm [shape: f32[1,128], index: 4, kind: input, shape index: {}]   ;;  %s1940_s5 = inlined_call_operand.hbm [shape: f32[128,128], index: 5, kind: output, shape index: {}]  }
   0x1   :  { %1954 = sst [smem:[#allocation22_spill]] %s1935_s0 }
   0x2   :  { %1955 = sst [smem:[#allocation23_spill]] %s1936_s1 }
   0x3   :  { %10 = vsyncpa [#allocation3], 0 }
   0x4   :  { %12 = vsyncpa [#allocation3 + $0x1], 0 }
   0x5   :  { %13 = vsyncpa [#allocation6], 0 }
   0x6   :  { %14 = vsyncpa [#allocation10], 0 }
   0x7   :  { %15 = vsyncpa [#allocation4], 0  ;;  %s1616_s18 = smov 0   ;;  %s1618_s19 = smov 0  }
   0x8   :  { %s1620_s20 = smov 0   ;;  %s1622_s21 = smov 0  }
   0x9   :  { %s1624_s22 = smov 0   ;;  %s1626_s23 = smov 0  }
   0xa LB: > { %1956 = sst [smem:[#allocation18_spill]] %s1558_s20  ;;  %s1645_s24 = sadd.s32 4294967295, %s1570_s23   ;;  %s1570_s23 = sphi %s1626_s23, %s21_s23   ;;  %s1566_s22 = sphi %s1624_s22, %s1989_s22   ;;  %s1562_s21 = sphi %s1622_s21, %s1988_s21   ;;  %s1558_s20 = sphi %s1620_s20, %s1984_s20   ;;  %s1554_s19 = sphi %s1618_s19, %s1987_s19   ;;  %s1550_s18 = sphi %s1616_s18, %s1986_s18  }
   0xb   : > { %1957 = sst [smem:[#allocation19_spill]] %s1570_s23  ;;  %p55_p0 = scmp.ne.s32.totalorder %s1554_s19, %s1550_s18 }
   0xc   : > { %p1941_p1 = scmp.eq.s32.totalorder %s1645_s24, 0  ;;  %p1068_p2 = scmp.ge.s32.totalorder %s1570_s23, 1 }
   0xd   : > { %p186_p3 = scmp.lt.s32.totalorder %s1570_s23, 9  ;;  %s1572_s27 = smov [#allocation5]  }
   0xe   : > { %p1653_p4 = por %p1941_p1, %p55_p0  ;;  %s198_s28 = sshll.u32 %s1572_s27, 4  ;;  %s199_s28 = int_to_ptr.vmem [resolvable:$true] %s198_s28 }
   0xf   : > { %p1657_p5 = pnand %p1068_p2, %p186_p3  ;;  %s30_s30 = sadd.s32 1, %s1566_s22 }
  0x10   : > { %s1958_s25 = scalar_select %p1653_p4, 1, 0 }
  0x11   : > { %s1959_s26 = scalar_select %p1657_p5, 1, 0 }
  0x12   : > { %p1226_p6 = pneg %p1657_p5  ;;  %s1961_s1 = sld [smem:[#allocation23_spill]] }
  0x14   : > { %p1665_p7 = pnand %p1226_p6, %p1941_p1 }
  0x16   : > { %s1960_s29 = scalar_select %p1665_p7, 1, 0 }
  0x17   : > { %p1678_p9 = pneg %p1665_p7 }
  0x18   : > { %s1330_s8 = scalar_lea.hbm %s1961_s1, 1024 }
  0x19   : > { %p1331_p8 = scmp.ne.s32.totalorder %s1961_s1, %s1330_s8  ;;  %p1337_p12 = scmp.lt.u32.totalorder %s1330_s8, %s1961_s1 }
  0x1b   : > { %p1333_p10 = pnand %p1678_p9, %p1331_p8 }
  0x1d   : > { %p1334_p11 = pneg %p1333_p10 }
  0x1f   : > { %p1339_p13 = pnand %p1337_p12, %p1334_p11 }
  0x21   : > { %1342 = shalt.err (!%p1339_p13)
}
  0x22   : > { %s1343_s14 = scalar_lea.vmem %s199_s28, 1024  ;;  %p1351_p6 = scmp.lt.s32.totalorder %s199_s28, %s199_s28 }
  0x23   : > { %p1344_p0 = scmp.ne.s32.totalorder %s199_s28, %s1343_s14  ;;  %p1352_p1 = scmp.lt.s32.totalorder %s1343_s14, %s1343_s14 }
  0x25   : > { %p1346_p2 = pnand %p1344_p0, %p1678_p9  ;;  %p1353_p4 = por %p1352_p1, %p1351_p6 }
  0x27   : > { %p1347_p3 = pneg %p1346_p2 }
  0x29   : > { %p1354_p5 = pnand %p1353_p4, %p1347_p3 }
  0x2b   : > { %1357 = shalt.err (!%p1354_p5)
}
  0x2c   : > { %s1944_s15 = smov 64   ;;  %s1945_s16 = smov 4  }
  0x2d   : > { %1229 = dma.hbm_to_vmem [thread:$0]  (!%p1665_p7), %s1961_s1, 1024, %s199_s28, [#allocation6], %s1944_s15, %s1944_s15, %s1945_s16  }
  0x2e   : > { %p31_p1 = scmp.ge.s32.totalorder %s30_s30, 8  ;;  %s42_s27 = sadd.s32 1, %s1558_s20 }
  0x2f   : > { %p49_p4 = scmp.ne.s32.totalorder %s1558_s20, %s1554_s19  ;;  %p50_p5 = scmp.eq.s32.totalorder %s1570_s23, 0 }
  0x30   : > { %s1991_s30 = smov (%p31_p1, %s30_s30), 0  ;;  %p1246_p11 = scmp.lt.s32.totalorder %s1570_s23, 8 }
  0x31   : > { %1963 = sst [smem:[#allocation20_spill]] %s1991_s30  ;;  %p1703_p8 = por %p50_p5, %p49_p4 }
  0x32   : > { %s37_s7 = ssub.s32 %s1566_s22, %s1991_s30  ;;  %s239_s8 = sand.u32 1, %s1570_s23  }
  0x33   : > { %p40_p10 = scmp.eq.s32.totalorder %s37_s7, 0  ;;  %s241_s9 = sand.u32 1, %s1558_s20  }
  0x34   : > { %s1073_s28 = sshll.u32 %s241_s9, 5  ;;  %s1108_s12 = sshll.u32 %s1566_s22, 9 }
  0x35   : > { %s1713_s10 = scalar_select %p40_p10, %s1558_s20, %s42_s27  }
  0x36   : > { %s1966_s0 = sld [smem:[#allocation22_spill]]  ;;  %s243_s18 = scalar_lea.vmem [#allocation2], %s1073_s28 }
  0x37   : > { %1965 = sst [smem:[#allocation21_spill]] %s1713_s10  ;;  %s252_s15 = sshll.u32 %s243_s18, 4  ;;  %s1721_s15 = int_to_ptr.vmem [resolvable:$true] %s252_s15 }
  0x38   : > { %p1725_p12 = pnand %p1246_p11, %p1703_p8  ;;  %s1729_s27 = sshll.u32 %s241_s9, 6 }
  0x39   : > { %s1731_s13 = scalar_lea.sflag [#allocation3], %s239_s8 }
  0x3a   : > { %s1967_s7 = scalar_select %p1725_p12, 1, 0 }
  0x3b   : > { %p1950_p0 = pneg %p1725_p12 }
  0x3c   : > { %s1719_s17 = scalar_lea.hbm %s1966_s0, %s1108_s12  ;;  %s1363_s14 = scalar_lea.hbm %s1966_s0, 4096 }
  0x3d   : > { %s1358_s12 = scalar_lea.hbm %s1719_s17, 512  ;;  %p1364_p6 = scmp.lt.u32.totalorder %s1719_s17, %s1966_s0 }
  0x3e   : > { %p1359_p13 = scmp.ne.s32.totalorder %s1719_s17, %s1358_s12  ;;  %p1365_p1 = scmp.lt.u32.totalorder %s1363_s14, %s1358_s12 }
  0x3f   : > { %p1367_p5 = scmp.lt.u32.totalorder %s1358_s12, %s1719_s17 }
  0x40   : > { %p1361_p2 = pnand %p1950_p0, %p1359_p13  ;;  %p1366_p4 = por %p1365_p1, %p1364_p6 }
  0x42   : > { %p1362_p3 = pneg %p1361_p2  ;;  %p1368_p8 = por %p1367_p5, %p1366_p4 }
  0x44   : > { %p1369_p10 = pnand %p1368_p8, %p1362_p3 }
  0x46   : > { %1372 = shalt.err (!%p1369_p10)
}
  0x47   : > { %s1373_s8 = scalar_lea.vmem %s1721_s15, 512  ;;  %s1575_s9 = smov [#allocation2]  }
  0x48   : > { %p1374_p11 = scmp.ne.s32.totalorder %s1721_s15, %s1373_s8  ;;  %s1378_s28 = sshll.u32 %s1575_s9, 4  ;;  %s1379_s28 = int_to_ptr.vmem [resolvable:$false] %s1378_s28 }
  0x49   : > { %s1380_s16 = scalar_lea.vmem %s1379_s28, 1024  ;;  %p1381_p7 = scmp.lt.s32.totalorder %s1721_s15, %s1379_s28 }
  0x4a   : > { %p1376_p13 = pnand %p1374_p11, %p1950_p0  ;;  %p1382_p6 = scmp.lt.s32.totalorder %s1380_s16, %s1373_s8 }
  0x4c   : > { %p1377_p2 = pneg %p1376_p13  ;;  %p1383_p1 = por %p1382_p6, %p1381_p7 }
  0x4e   : > { %p1384_p4 = pnand %p1383_p1, %p1377_p2 }
  0x50   : > { %1387 = shalt.err (!%p1384_p4)
}
  0x51   : > { %s1576_s12 = smov 128   ;;  %s1577_s6 = smov 8  }
  0x52   : > { %1239 = dma.hbm_to_vmem [thread:$0]  (!%p1725_p12), %s1719_s17, 512, %s1721_s15, %s1731_s13, %s1576_s12, %s1576_s12, %s1577_s6  }
  0x53   : > { %s266_s14 = scalar_lea.vmem [#allocation7], %s1729_s27  ;;  %s1578_s9 = smov [#allocation8]  }
  0x54   : > { %s1760_s18 = sshll.u32 %s266_s14, 4  ;;  %s214_s0 = sshll.u32 %s1578_s9, 4  ;;  %s215_s0 = int_to_ptr.vmem [resolvable:$true] %s214_s0  ;;  %s1805_s18 = int_to_ptr.vmem [resolvable:$true] %s1760_s18 }
  0x55   : > { %s1388_s16 = scalar_lea.hbm %s1938_s3, 2048 }
  0x56   : > { %p1389_p7 = scmp.ne.s32.totalorder %s1938_s3, %s1388_s16  ;;  %p1395_p8 = scmp.lt.u32.totalorder %s1388_s16, %s1938_s3 }
  0x58   : > { %p1391_p3 = pnand %p1389_p7, %p1678_p9 }
  0x5a   : > { %p1392_p5 = pneg %p1391_p3 }
  0x5c   : > { %p1397_p10 = pnand %p1395_p8, %p1392_p5 }
  0x5e   : > { %1400 = shalt.err (!%p1397_p10)
}
  0x5f   : > { %s1401_s15 = scalar_lea.vmem %s215_s0, 2048  ;;  %p1409_p6 = scmp.lt.s32.totalorder %s215_s0, %s215_s0 }
  0x60   : > { %p1402_p11 = scmp.ne.s32.totalorder %s215_s0, %s1401_s15  ;;  %p1410_p1 = scmp.lt.s32.totalorder %s1401_s15, %s1401_s15 }
  0x62   : > { %p1404_p13 = pnand %p1402_p11, %p1678_p9  ;;  %p1411_p4 = por %p1410_p1, %p1409_p6 }
  0x64   : > { %p1405_p2 = pneg %p1404_p13 }
  0x66   : > { %p1412_p0 = pnand %p1411_p4, %p1405_p2 }
  0x68   : > { %1415 = shalt.err (!%p1412_p0)
}
  0x69   : > { %p1968_p7 = scmp.ne.s32.totalorder %s1960_s29, 0  ;;  %s1579_s20 = smov [#allocation9]  }
  0x6a   : > { %s228_s10 = sshll.u32 %s1579_s20, 4  ;;  %s1109_s17 = sshll.u32 %s1566_s22, 10  ;;  %s229_s10 = int_to_ptr.vmem [resolvable:$true] %s228_s10 }
  0x6b   : > { %1232 = dma.hbm_to_vmem [thread:$0]  (!%p1968_p7), %s1938_s3, 2048, %s215_s0, [#allocation6], %s1576_s12, %s1576_s12, %s1577_s6  }
  0x6c   : > { %s1784_s9 = scalar_lea.hbm %s1937_s2, %s1109_s17  ;;  %s1416_s16 = scalar_lea.hbm %s1939_s4, 16 }
  0x6d   : > { %p1417_p0 = scmp.ne.s32.totalorder %s1939_s4, %s1416_s16  ;;  %p1423_p8 = scmp.lt.u32.totalorder %s1416_s16, %s1939_s4 }
  0x6f   : > { %p1419_p3 = pnand %p1417_p0, %p1678_p9 }
  0x71   : > { %p1420_p5 = pneg %p1419_p3 }
  0x73   : > { %p1425_p10 = pnand %p1423_p8, %p1420_p5 }
  0x75   : > { %1428 = shalt.err (!%p1425_p10)
}
  0x76   : > { %s1429_s6 = scalar_lea.vmem %s229_s10, 16  ;;  %s1436_s1 = scalar_lea.vmem %s229_s10, 32 }
  0x77   : > { %p1430_p11 = scmp.ne.s32.totalorder %s229_s10, %s1429_s6  ;;  %p1437_p6 = scmp.lt.s32.totalorder %s229_s10, %s229_s10 }
  0x78   : > { %p1438_p1 = scmp.lt.s32.totalorder %s1436_s1, %s1429_s6 }
  0x79   : > { %p1432_p13 = pnand %p1430_p11, %p1678_p9 }
  0x7a   : > { %p1439_p4 = por %p1438_p1, %p1437_p6 }
  0x7b   : > { %p1433_p2 = pneg %p1432_p13 }
  0x7d   : > { %p1440_p12 = pnand %p1439_p4, %p1433_p2 }
  0x7f   : > { %1443 = shalt.err (!%p1440_p12)
}
  0x80   : > { %1235 = dma.hbm_to_vmem [thread:$0]  (!%p1968_p7), %s1939_s4, 16, %s229_s10, [#allocation10]  }
  0x81   : > { %s1444_s11 = scalar_lea.hbm %s1784_s9, 1024  ;;  %p1969_p0 = scmp.ne.s32.totalorder %s1967_s7, 0 }
  0x82   : > { %p1445_p9 = scmp.ne.s32.totalorder %s1784_s9, %s1444_s11  ;;  %s1449_s17 = scalar_lea.hbm %s1937_s2, 8192 }
  0x83   : > { %p1970_p3 = pneg %p1969_p0  ;;  %p1450_p8 = scmp.lt.u32.totalorder %s1784_s9, %s1937_s2 }
  0x84   : > { %p1451_p10 = scmp.lt.u32.totalorder %s1449_s17, %s1444_s11  ;;  %p1453_p13 = scmp.lt.u32.totalorder %s1444_s11, %s1784_s9 }
  0x85   : > { %p1447_p5 = pnand %p1445_p9, %p1970_p3 }
  0x86   : > { %p1452_p11 = por %p1451_p10, %p1450_p8 }
  0x87   : > { %p1448_p12 = pneg %p1447_p5 }
  0x88   : > { %p1454_p7 = por %p1453_p13, %p1452_p11 }
  0x8a   : > { %p1455_p2 = pnand %p1454_p7, %p1448_p12 }
  0x8c   : > { %1458 = shalt.err (!%p1455_p2)
}
  0x8d   : > { %s1459_s10 = scalar_lea.vmem %s1805_s18, 1024  ;;  %p1971_p1 = pmov %p1970_p3 }
  0x8e   : > { %p1460_p6 = scmp.ne.s32.totalorder %s1805_s18, %s1459_s10  ;;  %s1580_s8 = smov [#allocation7]  }
  0x8f   : > { %s1464_s28 = sshll.u32 %s1580_s8, 4  ;;  %s1465_s28 = int_to_ptr.vmem [resolvable:$false] %s1464_s28 }
  0x90   : > { %p1462_p4 = pnand %p1460_p6, %p1971_p1  ;;  %s1466_s16 = scalar_lea.vmem %s1465_s28, 2048 }
  0x91   : > { %p1467_p3 = scmp.lt.s32.totalorder %s1805_s18, %s1465_s28  ;;  %p1468_p5 = scmp.lt.s32.totalorder %s1466_s16, %s1459_s10 }
  0x92   : > { %p1463_p9 = pneg %p1462_p4 }
  0x93   : > { %p1469_p8 = por %p1468_p5, %p1467_p3 }
  0x95   : > { %p1470_p10 = pnand %p1469_p8, %p1463_p9 }
  0x97   : > { %1473 = shalt.err (!%p1470_p10)
}
  0x98   : > { %s1972_s15 = smov 4   ;;  %s1973_s0 = smov 64  }
  0x99   : > { %1242 = dma.hbm_to_vmem [thread:$0]  (!%p1969_p0), %s1784_s9, 1024, %s1805_s18, %s1731_s13, %s1973_s0, %s1973_s0, %s1972_s15  }
  0x9a   : > { %p1974_p12 = scmp.ne.s32.totalorder %s1959_s26, 0 }
  0x9b   : > { %s287_s12 = sand.u32 (!%p1974_p12), 1, %s1645_s24   ;;  %s289_s6 = sand.u32 (!%p1974_p12), 1, %s1554_s19  }
  0x9c   : > { %285 = sbr.rel (%p1974_p12) target bundleno = 842 (0x34a), region = 40  ;;  %s1080_s1 = sshll.u32 (!%p1974_p12), %s289_s6, 5 }
  0x9d   : > { %s288_s23 = scalar_lea.sflag (!%p1974_p12), [#allocation3], %s287_s12  ;;  %s1838_s30 = scalar_lea.vmem (!%p1974_p12), [#allocation2], %s1080_s1 }
  0x9e   : > { %p1975_p11 = scmp.ne.s32.totalorder (!%p1974_p12), %s1958_s25, 0 }
  0xa3   : > { %1525 = dma.done.wait (%p1975_p11), %s288_s23, 512  }
  0xa4   : > { %1527 = vsyncadd (%p1975_p11), %s288_s23, 4294966784  ;;  %p1976_p13 = scmp.eq.s32.totalorder %s1645_s24, 0 }
  0xa6   : > { %1529 = dma.done.wait (%p1976_p13), [#allocation6], 1024   ;;  %p1977_p0 = pmov %p1976_p13 }
  0xa7   : > { %s1082_s26 = sshll.u32 %s289_s6, 6 }
  0xa8   : > { %1531 = vsyncadd (%p1977_p0), [#allocation6], 4294966272  ;;  %s1848_s7 = scalar_lea.vmem [#allocation7], %s1082_s26 }
  0xa9   : > { %1533 = dma.done.wait (%p1975_p11), %s288_s23, 1024  }
  0xaa   : > { %1535 = vsyncadd (%p1975_p11), %s288_s23, 4294966272  ;;  %p1978_p7 = pmov %p1977_p0 }
  0xab   : > { %p1979_p2 = pmov %p1977_p0 }
  0xac   : > { %1537 = dma.done.wait (%p1978_p7), [#allocation6], 2048  }
  0xad   : > { %1539 = vsyncadd (%p1979_p2), [#allocation6], 4294965248  ;;  %p1980_p6 = pmov %p1977_p0 }
  0xae   : > { %p1981_p1 = pmov %p1977_p0 }
  0xaf   : > { %1541 = dma.done.wait (%p1980_p6), [#allocation10], 16  }
  0xb0   : > { %1543 = vsyncadd (%p1981_p1), [#allocation10], 4294967280  ;;  %p1085_p4 = scmp.ne.s32.totalorder %s1562_s21, 0 }
  0xb1   : > { %v1581_v0 = vmov (!%p1085_p4), 0.0  }
  0xb2   : > { %346 = sbr.rel (%p1085_p4) target bundleno = 186 (0xba), region = 64  ;;  %347 = vst [vmem:[#allocation11] sm:$0xff] (!%p1085_p4), %v1581_v0  ;;  %348 = vst [vmem:[#allocation11 + $0x8] sm:$0xff] (!%p1085_p4), %v1581_v0 }
  0xb3   : > { %349 = vst [vmem:[#allocation11 + $0x10] sm:$0xff] (!%p1085_p4), %v1581_v0  ;;  %350 = vst [vmem:[#allocation11 + $0x18] sm:$0xff] (!%p1085_p4), %v1581_v0 }
  0xb4   : > { %351 = vst [vmem:[#allocation11 + $0x20] sm:$0xff] (!%p1085_p4), %v1581_v0  ;;  %352 = vst [vmem:[#allocation11 + $0x28] sm:$0xff] (!%p1085_p4), %v1581_v0 }
  0xb5   : > { %353 = vst [vmem:[#allocation11 + $0x30] sm:$0xff] (!%p1085_p4), %v1581_v0  ;;  %354 = vst [vmem:[#allocation11 + $0x38] sm:$0xff] (!%p1085_p4), %v1581_v0 }
  0xb6   : > { %355 = vst [vmem:[#allocation11 + $0x40] sm:$0xff] (!%p1085_p4), %v1581_v0  ;;  %356 = vst [vmem:[#allocation11 + $0x48] sm:$0xff] (!%p1085_p4), %v1581_v0 }
  0xb7   : > { %357 = vst [vmem:[#allocation11 + $0x50] sm:$0xff] (!%p1085_p4), %v1581_v0  ;;  %358 = vst [vmem:[#allocation11 + $0x58] sm:$0xff] (!%p1085_p4), %v1581_v0 }
  0xb8   : > { %359 = vst [vmem:[#allocation11 + $0x60] sm:$0xff] (!%p1085_p4), %v1581_v0  ;;  %360 = vst [vmem:[#allocation11 + $0x68] sm:$0xff] (!%p1085_p4), %v1581_v0 }
  0xb9   : > { %361 = vst [vmem:[#allocation11 + $0x70] sm:$0xff] %v1581_v0  ;;  %362 = vst [vmem:[#allocation11 + $0x78] sm:$0xff] %v1581_v0 }
  0xba PF: > { %v1312_v1 = vld [vmem:[%s1848_s7] sm:$0xff]   ;;  %v1313_v2 = vld [vmem:[%s1848_s7 + $0x8] sm:$0xff]   ;;  %v1314_v3 = vld [vmem:[%s1848_s7 + $0x10] sm:$0xff]   ;;  %p1102_p9 = scmp.ne.s32.totalorder %s1562_s21, 7 }
  0xbb   : > { %1142 = vmatprep.subr.bf16.mxu0 %v1312_v1  ;;  %v1315_v4 = vld [vmem:[%s1848_s7 + $0x18] sm:$0xff]   ;;  %v1320_v5 = vld [vmem:[#allocation5] sm:$0xff]   ;;  %v1317_v7 = vld [vmem:[%s1848_s7 + $0x28] sm:$0xff]  }
  0xbc   : > { %1143 = vmatpush3.bf16.msra.mxu0 %v1312_v1  ;;  %1158 = vmatprep.mubr.bf16.mxu0 %v1320_v5  ;;  %v1316_v6 = vld [vmem:[%s1848_s7 + $0x20] sm:$0xff]   ;;  %v1318_v8 = vld [vmem:[%s1848_s7 + $0x30] sm:$0xff]   ;;  %v1319_v9 = vld [vmem:[%s1848_s7 + $0x38] sm:$0xff]  }
  0xbd   : > { %1144 = vmatprep.subr.bf16.mxu0 %v1313_v2  ;;  %v1321_v10 = vld [vmem:[#allocation5 + $0x8] sm:$0xff]   ;;  %v1322_v11 = vld [vmem:[#allocation5 + $0x10] sm:$0xff]   ;;  %v1323_v12 = vld [vmem:[#allocation5 + $0x18] sm:$0xff]  }
  0xbe   : > { %v1324_v13 = vld [vmem:[#allocation5 + $0x20] sm:$0xff]   ;;  %v1325_v14 = vld [vmem:[#allocation5 + $0x28] sm:$0xff]   ;;  %v1326_v15 = vld [vmem:[#allocation5 + $0x30] sm:$0xff]  }
  0xbf   : > { %v1327_v16 = vld [vmem:[#allocation5 + $0x38] sm:$0xff]   ;;  %v588_v17 = vld [vmem:[%s1838_s30] sm:$0xff]  ;;  %v589_v43 = vld [vmem:[%s1838_s30 + $0x8] sm:$0xff] }
  0xc0   : > { %1145 = vmatpush3.bf16.msra.mxu0 %v1313_v2  ;;  %v592_v18 = vunpack.c.l.s8.bf16 %v588_v17  ;;  %v593_v44 = vunpack.c.h.s8.bf16 %v588_v17  ;;  %v594_v45 = vunpack.c.l.s8.bf16 %v589_v43  ;;  %v590_v46 = vld [vmem:[%s1838_s30 + $0x10] sm:$0xff]  ;;  %v595_v47 = vunpack.c.h.s8.bf16 %v589_v43  ;;  %v591_v49 = vld [vmem:[%s1838_s30 + $0x18] sm:$0xff]  ;;  %v600_v54 = vld [vmem:[#allocation11] sm:$0xff] }
  0xc1   : > { %1146 = vmatprep.subr.bf16.mxu0 %v1314_v3  ;;  %v596_v48 = vunpack.c.l.s8.bf16 %v590_v46  ;;  %v597_v50 = vunpack.c.h.s8.bf16 %v590_v46  ;;  %v598_v51 = vunpack.c.l.s8.bf16 %v591_v49  ;;  %v599_v52 = vunpack.c.h.s8.bf16 %v591_v49  ;;  %v602_v53 = vld [vmem:[#allocation11 + $0x10] sm:$0xff]  ;;  %v603_v56 = vld [vmem:[#allocation11 + $0x18] sm:$0xff]  ;;  %v601_v59 = vld [vmem:[#allocation11 + $0x8] sm:$0xff] }
  0xc2   : > { %1190 = vmatprep.mubr.bf16.mxu1 %v592_v18  ;;  %v606_v1 = vld [vmem:[#allocation11 + $0x30] sm:$0xff]  ;;  %v604_v2 = vld [vmem:[#allocation11 + $0x20] sm:$0xff] }
  0xc3   : > { %v777_v43 = vld [vmem:[#allocation8 + $0x20] sm:$0xff] (!%p1102_p9)  ;;  %v782_v46 = vld [vmem:[#allocation8 + $0x48] sm:$0xff] (!%p1102_p9)  ;;  %v783_v49 = vld [vmem:[#allocation8 + $0x50] sm:$0xff] (!%p1102_p9) }
  0xc4   : > { %1147 = vmatpush3.bf16.msra.mxu0 %v1314_v3 }
  0xc5   : > { %1148 = vmatprep.subr.bf16.mxu0 %v1315_v4 }
  0xc8   : > { %1149 = vmatpush3.bf16.msra.mxu0 %v1315_v4  ;;  %v607_v4 = vld [vmem:[#allocation11 + $0x38] sm:$0xff] }
  0xc9   : > { %1150 = vmatprep.subr.bf16.mxu0 %v1316_v6 }
  0xcc   : > { %1151 = vmatpush3.bf16.msra.mxu0 %v1316_v6 }
  0xcd   : > { %1152 = vmatprep.subr.bf16.mxu0 %v1317_v7 }
  0xd0   : > { %1153 = vmatpush3.bf16.msra.mxu0 %v1317_v7  ;;  %v605_v7 = vld [vmem:[#allocation11 + $0x28] sm:$0xff] }
  0xd1   : > { %1154 = vmatprep.subr.bf16.mxu0 %v1318_v8 }
  0xd4   : > { %1155 = vmatpush3.bf16.msra.mxu0 %v1318_v8 }
  0xd5   : > { %1156 = vmatprep.subr.bf16.mxu0 %v1319_v9 }
  0xd8   : > { %1157 = vmatpush3.bf16.msra.mxu0 %v1319_v9 }
  0xdb   : > { %1159 = vmatmul.mubr.bf16.vlgmr.msra.gmra.mrb[0].mxu0 %v1321_v10 }
  0xdc   : > { %1162 = vmatprep.mubr.bf16.mxu0 %v1322_v11 }
  0xe3   : > { %1163 = vmatmul.mubr.bf16.gmra.mrb[4].mxu0 %v1323_v12 }
  0xe4   : > { %1166 = vmatprep.mubr.bf16.mxu0 %v1324_v13  ;;  %v610_v13 = vld [vmem:[#allocation11 + $0x50] sm:$0xff] }
  0xeb   : > { %1167 = vmatmul.mubr.bf16.gmra.mrb[8].mxu0 %v1325_v14  ;;  %v608_v14 = vld [vmem:[#allocation11 + $0x40] sm:$0xff] }
  0xec   : > { %1170 = vmatprep.mubr.bf16.mxu0 %v1326_v15 }
  0xf3   : > { %1171 = vmatmul.mubr.bf16.gmra.mrb[12].mxu0 %v1327_v16  ;;  %v611_v16 = vld [vmem:[#allocation11 + $0x58] sm:$0xff] }
 0x1ae   : > { %v1160_v19 = vpop.f32.mrb[0].mxu0 }
 0x1af   : > { %v525_v20 = vpop.f32.mrb[1].mxu0 }
 0x1b0   : > { %v1161_v21 = vpop.f32.mrb[2].mxu0 }
 0x1b1   : > { %v617_v22 = vpack.c.bf16 %v1161_v21, %v1160_v19  ;;  %v528_v23 = vpop.f32.mrb[3].mxu0  ;;  %v609_v19 = vld [vmem:[#allocation11 + $0x48] sm:$0xff] }
 0x1b2   : > { %v616_v24 = vpack.c.bf16 %v528_v23, %v525_v20 }
 0x1b4   : > { %1174 = vmatprep.subr.bf16.mxu1 %v616_v24 }
 0x1b5   : > { %1175 = vmatpush3.bf16.msra.mxu1 %v616_v24 }
 0x1b6   : > { %v1164_v25 = vpop.f32.mrb[4].mxu0  ;;  %1176 = vmatprep.subr.bf16.mxu1 %v617_v22 }
 0x1b7   : > { %v541_v26 = vpop.f32.mrb[5].mxu0 }
 0x1b8   : > { %v1165_v27 = vpop.f32.mrb[6].mxu0 }
 0x1b9   : > { %v619_v28 = vpack.c.bf16 %v1165_v27, %v1164_v25  ;;  %v544_v29 = vpop.f32.mrb[7].mxu0  ;;  %1177 = vmatpush3.bf16.msra.mxu1 %v617_v22  ;;  %v614_v25 = vld [vmem:[#allocation11 + $0x70] sm:$0xff] }
 0x1ba   : > { %v618_v30 = vpack.c.bf16 %v544_v29, %v541_v26  ;;  %v612_v26 = vld [vmem:[#allocation11 + $0x60] sm:$0xff] }
 0x1bc   : > { %1178 = vmatprep.subr.bf16.mxu1 %v618_v30 }
 0x1bd   : > { %1179 = vmatpush3.bf16.msra.mxu1 %v618_v30 }
 0x1be   : > { %v1168_v31 = vpop.f32.mrb[8].mxu0  ;;  %1180 = vmatprep.subr.bf16.mxu1 %v619_v28 }
 0x1bf   : > { %v557_v32 = vpop.f32.mrb[9].mxu0 }
 0x1c0   : > { %v1169_v33 = vpop.f32.mrb[10].mxu0 }
 0x1c1   : > { %v621_v34 = vpack.c.bf16 %v1169_v33, %v1168_v31  ;;  %v560_v35 = vpop.f32.mrb[11].mxu0  ;;  %1181 = vmatpush3.bf16.msra.mxu1 %v619_v28  ;;  %v615_v28 = vld [vmem:[#allocation11 + $0x78] sm:$0xff]  ;;  %v613_v31 = vld [vmem:[#allocation11 + $0x68] sm:$0xff] }
 0x1c2   : > { %v620_v36 = vpack.c.bf16 %v560_v35, %v557_v32 }
 0x1c4   : > { %1182 = vmatprep.subr.bf16.mxu1 %v620_v36 }
 0x1c5   : > { %1183 = vmatpush3.bf16.msra.mxu1 %v620_v36 }
 0x1c6   : > { %v1172_v37 = vpop.f32.mrb[12].mxu0  ;;  %1184 = vmatprep.subr.bf16.mxu1 %v621_v34 }
 0x1c7   : > { %v573_v38 = vpop.f32.mrb[13].mxu0 }
 0x1c8   : > { %v1173_v39 = vpop.f32.mrb[14].mxu0 }
 0x1c9   : > { %v623_v40 = vpack.c.bf16 %v1173_v39, %v1172_v37  ;;  %v576_v41 = vpop.f32.mrb[15].mxu0  ;;  %1185 = vmatpush3.bf16.msra.mxu1 %v621_v34  ;;  %v775_v37 = vld [vmem:[#allocation8 + $0x10] sm:$0xff] (!%p1102_p9)  ;;  %v1582_v39 = vmov (!%p1102_p9), 0  }
 0x1ca   : > { %v622_v42 = vpack.c.bf16 %v576_v41, %v573_v38  ;;  %v773_v38 = vld [vmem:[#allocation8] sm:$0xff] (!%p1102_p9)  ;;  %1329 = vset.pattern.permute.xlu1 (!%p1102_p9), %v1582_v39  ;;  %1328 = vset.pattern.permute.xlu0 (!%p1102_p9), %v1582_v39  ;;  %v774_v41 = vld [vmem:[#allocation8 + $0x8] sm:$0xff] (!%p1102_p9) }
 0x1cb   : > { %801 = vperm.xlu1 (!%p1102_p9), %1329, %v775_v37   ;;  %791 = vperm.xlu0 (!%p1102_p9), %1328, %v773_v38  }
 0x1cc   : > { %1186 = vmatprep.subr.bf16.mxu1 %v622_v42 }
 0x1cd   : > { %1187 = vmatpush3.bf16.msra.mxu1 %v622_v42  ;;  %v778_v42 = vld [vmem:[#allocation8 + $0x28] sm:$0xff] (!%p1102_p9) }
 0x1ce   : > { %1188 = vmatprep.subr.bf16.mxu1 %v623_v40 }
 0x1cf   : > { %796 = vperm.xlu0 (!%p1102_p9), %1328, %v774_v41  }
 0x1d1   : > { %1189 = vmatpush3.bf16.msra.mxu1 %v623_v40  ;;  %v776_v40 = vld [vmem:[#allocation8 + $0x18] sm:$0xff] (!%p1102_p9) }
 0x1d2   : > { %806 = vperm.xlu1 (!%p1102_p9), %1329, %v776_v40  }
 0x1d3   : > { %811 = vperm.xlu0 (!%p1102_p9), %1328, %v777_v43  }
 0x1d4   : > { %1191 = vmatmul.mubr.bf16.vlgmr.msra.gmra.mrb[0].mxu1 %v593_v44  ;;  %v780_v44 = vld [vmem:[#allocation8 + $0x38] sm:$0xff] (!%p1102_p9) }
 0x1d5   : > { %1194 = vmatprep.mubr.bf16.mxu1 %v594_v45  ;;  %v779_v45 = vld [vmem:[#allocation8 + $0x30] sm:$0xff] (!%p1102_p9) }
 0x1d6   : > { %816 = vperm.xlu1 (!%p1102_p9), %1329, %v778_v42  }
 0x1d7   : > { %821 = vperm.xlu0 (!%p1102_p9), %1328, %v779_v45  }
 0x1da   : > { %826 = vperm.xlu1 (!%p1102_p9), %1329, %v780_v44  }
 0x1dc   : > { %1195 = vmatmul.mubr.bf16.gmra.mrb[4].mxu1 %v595_v47  ;;  %v781_v47 = vld [vmem:[#allocation8 + $0x40] sm:$0xff] (!%p1102_p9) }
 0x1dd   : > { %1198 = vmatprep.mubr.bf16.mxu1 %v596_v48  ;;  %831 = vperm.xlu0 (!%p1102_p9), %1328, %v781_v47   ;;  %v784_v48 = vld [vmem:[#allocation8 + $0x58] sm:$0xff] (!%p1102_p9) }
 0x1de   : > { %836 = vperm.xlu1 (!%p1102_p9), %1329, %v782_v46  }
 0x1e1   : > { %841 = vperm.xlu0 (!%p1102_p9), %1328, %v783_v49  }
 0x1e2   : > { %846 = vperm.xlu1 (!%p1102_p9), %1329, %v784_v48  }
 0x1e4   : > { %1199 = vmatmul.mubr.bf16.gmra.mrb[8].mxu1 %v597_v50  ;;  %v786_v50 = vld [vmem:[#allocation8 + $0x68] sm:$0xff] (!%p1102_p9) }
 0x1e5   : > { %1202 = vmatprep.mubr.bf16.mxu1 %v598_v51  ;;  %v785_v51 = vld [vmem:[#allocation8 + $0x60] sm:$0xff] (!%p1102_p9) }
 0x1e6   : > { %856 = vperm.xlu1 (!%p1102_p9), %1329, %v786_v50   ;;  %851 = vperm.xlu0 (!%p1102_p9), %1328, %v785_v51  }
 0x1ec   : > { %1203 = vmatmul.mubr.bf16.gmra.mrb[12].mxu1 %v599_v52  ;;  %v788_v52 = vld [vmem:[#allocation8 + $0x78] sm:$0xff] (!%p1102_p9) }
 0x1ed   : > { %866 = vperm.xlu1 (!%p1102_p9), %1329, %v788_v52  }
 0x2a7   : > { %v1192_v55 = vpop.f32.mrb[0].mxu1 }
 0x2a8   : > { %v723_v57 = vadd.f32 %v1192_v55, %v602_v53  ;;  %v658_v58 = vpop.f32.mrb[1].mxu1  ;;  %v787_v53 = vld [vmem:[#allocation8 + $0x70] sm:$0xff] (!%p1102_p9) }
 0x2a9   : > { %v721_v60 = vadd.f32 %v658_v58, %v600_v54  ;;  %v1193_v61 = vpop.f32.mrb[2].mxu1  ;;  %861 = vperm.xlu0 (!%p1102_p9), %1328, %v787_v53   ;;  %v792_v58 = vpop.permute.xlu0 (!%p1102_p9), %791 }
 0x2aa   : > { %739 = vst [vmem:[#allocation11 + $0x10] sm:$0xff] %v723_v57  ;;  %v724_v62 = vadd.f32 %v1193_v61, %v603_v56  ;;  %v661_v63 = vpop.f32.mrb[3].mxu1  ;;  %v1876_v56 = vld [vmem:[#allocation9] ss:$0 sm:$0xff] (!%p1102_p9)  ;;  %v802_v57 = vpop.permute.xlu1 (!%p1102_p9), %801 }
 0x2ab   : > { %737 = vst [vmem:[#allocation11] sm:$0xff] %v721_v60  ;;  %v722_v0 = vadd.f32 %v661_v63, %v601_v59 }
 0x2ac   : > { %740 = vst [vmem:[#allocation11 + $0x18] sm:$0xff] %v724_v62 }
 0x2ad   : > { %738 = vst [vmem:[#allocation11 + $0x8] sm:$0xff] %v722_v0 }
 0x2af   : > { %v1196_v3 = vpop.f32.mrb[4].mxu1 }
 0x2b0   : > { %v727_v5 = vadd.f32 %v1196_v3, %v606_v1  ;;  %v674_v6 = vpop.f32.mrb[5].mxu1  ;;  %v807_v1 = vpop.permute.xlu1 (!%p1102_p9), %806 }
 0x2b1   : > { %v725_v8 = vadd.f32 %v674_v6, %v604_v2  ;;  %v1197_v9 = vpop.f32.mrb[6].mxu1  ;;  %v759_v54 = vld [vmem:[#allocation11 + $0x10] sm:$0xff] (!%p1102_p9)  ;;  %v797_v2 = vpop.permute.xlu0 (!%p1102_p9), %796 }
 0x2b2   : > { %743 = vst [vmem:[#allocation11 + $0x30] sm:$0xff] %v727_v5  ;;  %v728_v10 = vadd.f32 %v1197_v9, %v607_v4  ;;  %v677_v11 = vpop.f32.mrb[7].mxu1  ;;  %v757_v55 = vld [vmem:[#allocation11] sm:$0xff] (!%p1102_p9)  ;;  %v871_v59 = vmul.f32 (!%p1102_p9), %v802_v57, %v759_v54 }
 0x2b3   : > { %741 = vst [vmem:[#allocation11 + $0x20] sm:$0xff] %v725_v8  ;;  %v726_v12 = vadd.f32 %v677_v11, %v605_v7  ;;  %v869_v60 = vmul.f32 (!%p1102_p9), %v792_v58, %v757_v55  ;;  %v760_v61 = vld [vmem:[#allocation11 + $0x18] sm:$0xff] (!%p1102_p9) }
 0x2b4   : > { %744 = vst [vmem:[#allocation11 + $0x38] sm:$0xff] %v728_v10  ;;  %v758_v62 = vld [vmem:[#allocation11 + $0x8] sm:$0xff] (!%p1102_p9)  ;;  %v894_v63 = vadd.f32 (!%p1102_p9), %v1876_v56, %v871_v59  ;;  %v872_v5 = vmul.f32 (!%p1102_p9), %v807_v1, %v760_v61  ;;  %v817_v11 = vpop.permute.xlu1 (!%p1102_p9), %816 }
 0x2b5   : > { %742 = vst [vmem:[#allocation11 + $0x28] sm:$0xff] %v726_v12  ;;  %v892_v0 = vadd.f32 (!%p1102_p9), %v1876_v56, %v869_v60  ;;  %v870_v6 = vmul.f32 (!%p1102_p9), %v797_v2, %v758_v62  ;;  %v812_v12 = vpop.permute.xlu0 (!%p1102_p9), %811 }
 0x2b6   : > { %v910_v3 = vmax.f32 (!%p1102_p9), %v894_v63, 0.0  ;;  %v895_v9 = vadd.f32 (!%p1102_p9), %v1876_v56, %v872_v5 }
 0x2b7   : > { %v1200_v15 = vpop.f32.mrb[8].mxu1  ;;  %v908_v4 = vmax.f32 (!%p1102_p9), %v892_v0, 0.0  ;;  %v893_v10 = vadd.f32 (!%p1102_p9), %v1876_v56, %v870_v6 }
 0x2b8   : > { %v731_v17 = vadd.f32 %v1200_v15, %v610_v13  ;;  %v690_v18 = vpop.f32.mrb[9].mxu1  ;;  %926 = vst [vmem:[#allocation11 + $0x10] sm:$0xff] (!%p1102_p9), %v910_v3  ;;  %v911_v13 = vmax.f32 (!%p1102_p9), %v895_v9, 0.0 }
 0x2b9   : > { %v729_v20 = vadd.f32 %v690_v18, %v608_v14  ;;  %v1201_v21 = vpop.f32.mrb[10].mxu1  ;;  %924 = vst [vmem:[#allocation11] sm:$0xff] (!%p1102_p9), %v908_v4  ;;  %v909_v14 = vmax.f32 (!%p1102_p9), %v893_v10, 0.0  ;;  %v763_v18 = vld [vmem:[#allocation11 + $0x30] sm:$0xff] (!%p1102_p9) }
 0x2ba   : > { %747 = vst [vmem:[#allocation11 + $0x50] sm:$0xff] %v731_v17  ;;  %v732_v22 = vadd.f32 %v1201_v21, %v611_v16  ;;  %v693_v23 = vpop.f32.mrb[11].mxu1  ;;  %v761_v8 = vld [vmem:[#allocation11 + $0x20] sm:$0xff] (!%p1102_p9)  ;;  %927 = vst [vmem:[#allocation11 + $0x18] sm:$0xff] (!%p1102_p9), %v911_v13  ;;  %v827_v21 = vpop.permute.xlu1 (!%p1102_p9), %826 }
 0x2bb   : > { %745 = vst [vmem:[#allocation11 + $0x40] sm:$0xff] %v729_v20  ;;  %v730_v24 = vadd.f32 %v693_v23, %v609_v19  ;;  %v873_v16 = vmul.f32 (!%p1102_p9), %v812_v12, %v761_v8  ;;  %v764_v17 = vld [vmem:[#allocation11 + $0x38] sm:$0xff] (!%p1102_p9)  ;;  %925 = vst [vmem:[#allocation11 + $0x8] sm:$0xff] (!%p1102_p9), %v909_v14 }
 0x2bc   : > { %748 = vst [vmem:[#allocation11 + $0x58] sm:$0xff] %v732_v22  ;;  %v762_v7 = vld [vmem:[#allocation11 + $0x28] sm:$0xff] (!%p1102_p9)  ;;  %v822_v22 = vpop.permute.xlu0 (!%p1102_p9), %821 }
 0x2bd   : > { %746 = vst [vmem:[#allocation11 + $0x48] sm:$0xff] %v730_v24  ;;  %v874_v15 = vmul.f32 (!%p1102_p9), %v817_v11, %v762_v7  ;;  %v896_v20 = vadd.f32 (!%p1102_p9), %v1876_v56, %v873_v16 }
 0x2bf   : > { %v1204_v27 = vpop.f32.mrb[12].mxu1  ;;  %756 = sbr.rel (%p1102_p9) target bundleno = 816 (0x330), region = 68  ;;  %v897_v19 = vadd.f32 (!%p1102_p9), %v1876_v56, %v874_v15  ;;  %v912_v24 = vmax.f32 (!%p1102_p9), %v896_v20, 0.0 }
 0x2c0   : > { %v735_v29 = vadd.f32 %v1204_v27, %v614_v25  ;;  %v706_v30 = vpop.f32.mrb[13].mxu1  ;;  %v876_v25 = vmul.f32 (!%p1102_p9), %v827_v21, %v764_v17 }
 0x2c1   : > { %v733_v32 = vadd.f32 %v706_v30, %v612_v26  ;;  %v1205_v33 = vpop.f32.mrb[14].mxu1  ;;  %v913_v23 = vmax.f32 (!%p1102_p9), %v897_v19, 0.0  ;;  %v875_v26 = vmul.f32 (!%p1102_p9), %v822_v22, %v763_v18  ;;  %928 = vst [vmem:[#allocation11 + $0x20] sm:$0xff] (!%p1102_p9), %v912_v24  ;;  %v767_v38 = vld [vmem:[#allocation11 + $0x50] sm:$0xff] (!%p1102_p9) }
 0x2c2   : > { %751 = vst [vmem:[#allocation11 + $0x70] sm:$0xff] %v735_v29  ;;  %v736_v34 = vadd.f32 %v1205_v33, %v615_v28  ;;  %v709_v35 = vpop.f32.mrb[15].mxu1  ;;  %v765_v28 = vld [vmem:[#allocation11 + $0x40] sm:$0xff] (!%p1102_p9)  ;;  %v899_v29 = vadd.f32 (!%p1102_p9), %v1876_v56, %v876_v25 }
 0x2c3   : > { %749 = vst [vmem:[#allocation11 + $0x60] sm:$0xff] %v733_v32  ;;  %v734_v36 = vadd.f32 %v709_v35, %v613_v31  ;;  %929 = vst [vmem:[#allocation11 + $0x28] sm:$0xff] (!%p1102_p9), %v913_v23  ;;  %v898_v30 = vadd.f32 (!%p1102_p9), %v1876_v56, %v875_v26  ;;  %v837_v31 = vpop.permute.xlu1 (!%p1102_p9), %836  ;;  %v832_v32 = vpop.permute.xlu0 (!%p1102_p9), %831  ;;  %v768_v37 = vld [vmem:[#allocation11 + $0x58] sm:$0xff] (!%p1102_p9) }
 0x2c4   : > { %752 = vst [vmem:[#allocation11 + $0x78] sm:$0xff] %v736_v34  ;;  %v766_v27 = vld [vmem:[#allocation11 + $0x48] sm:$0xff] (!%p1102_p9)  ;;  %v915_v33 = vmax.f32 (!%p1102_p9), %v899_v29, 0.0 }
 0x2c5   : > { %750 = vst [vmem:[#allocation11 + $0x68] sm:$0xff] %v734_v36  ;;  %v914_v34 = vmax.f32 (!%p1102_p9), %v898_v30, 0.0  ;;  %v878_v35 = vmul.f32 (!%p1102_p9), %v837_v31, %v766_v27  ;;  %v877_v36 = vmul.f32 (!%p1102_p9), %v832_v32, %v765_v28 }
 0x2c6   : > { %931 = vst [vmem:[#allocation11 + $0x38] sm:$0xff] %v915_v33 }
 0x2c7   : > { %930 = vst [vmem:[#allocation11 + $0x30] sm:$0xff] %v914_v34  ;;  %v901_v39 = vadd.f32 %v1876_v56, %v878_v35  ;;  %v900_v40 = vadd.f32 %v1876_v56, %v877_v36  ;;  %v847_v41 = vpop.permute.xlu1 %846  ;;  %v842_v42 = vpop.permute.xlu0 %841 }
 0x2c8   : > { %v880_v45 = vmul.f32 %v847_v41, %v768_v37  ;;  %v879_v46 = vmul.f32 %v842_v42, %v767_v38 }
 0x2c9   : > { %v917_v43 = vmax.f32 %v901_v39, 0.0  ;;  %v916_v44 = vmax.f32 %v900_v40, 0.0  ;;  %v771_v59 = vld [vmem:[#allocation11 + $0x70] sm:$0xff] }
 0x2ca   : > { %v769_v48 = vld [vmem:[#allocation11 + $0x60] sm:$0xff]  ;;  %v903_v49 = vadd.f32 %v1876_v56, %v880_v45  ;;  %v902_v50 = vadd.f32 %v1876_v56, %v879_v46 }
 0x2cb   : > { %933 = vst [vmem:[#allocation11 + $0x48] sm:$0xff] %v917_v43  ;;  %932 = vst [vmem:[#allocation11 + $0x40] sm:$0xff] %v916_v44  ;;  %v857_v51 = vpop.permute.xlu1 %856  ;;  %v852_v52 = vpop.permute.xlu0 %851  ;;  %v772_v58 = vld [vmem:[#allocation11 + $0x78] sm:$0xff] }
 0x2cc   : > { %v770_v47 = vld [vmem:[#allocation11 + $0x68] sm:$0xff]  ;;  %v919_v53 = vmax.f32 %v903_v49, 0.0  ;;  %v918_v54 = vmax.f32 %v902_v50, 0.0  ;;  %v881_v57 = vmul.f32 %v852_v52, %v769_v48 }
 0x2cd   : > { %v882_v55 = vmul.f32 %v857_v51, %v770_v47 }
 0x2ce   : > { %935 = vst [vmem:[#allocation11 + $0x58] sm:$0xff] %v919_v53  ;;  %934 = vst [vmem:[#allocation11 + $0x50] sm:$0xff] %v918_v54  ;;  %v904_v61 = vadd.f32 %v1876_v56, %v881_v57 }
 0x2cf   : > { %v905_v60 = vadd.f32 %v1876_v56, %v882_v55  ;;  %v867_v62 = vpop.permute.xlu1 %866 }
 0x2d0   : > { %v920_v1 = vmax.f32 %v904_v61, 0.0  ;;  %v884_v2 = vmul.f32 %v867_v62, %v772_v58 }
 0x2d1   : > { %v921_v0 = vmax.f32 %v905_v60, 0.0 }
 0x2d2   : > { %936 = vst [vmem:[#allocation11 + $0x60] sm:$0xff] %v920_v1  ;;  %v907_v4 = vadd.f32 %v1876_v56, %v884_v2 }
 0x2d3   : > { %937 = vst [vmem:[#allocation11 + $0x68] sm:$0xff] %v921_v0 }
 0x2d4   : > { %v923_v6 = vmax.f32 %v907_v4, 0.0 }
 0x2d6   : > { %939 = vst [vmem:[#allocation11 + $0x78] sm:$0xff] %v923_v6 }
 0x328   : > { %v862_v63 = vpop.permute.xlu0 %861 }
 0x329   : > { %v883_v3 = vmul.f32 %v862_v63, %v771_v59 }
 0x32b   : > { %v906_v5 = vadd.f32 %v1876_v56, %v883_v3 }
 0x32d   : > { %v922_v7 = vmax.f32 %v906_v5, 0.0 }
 0x32f   : > { %938 = vst [vmem:[#allocation11 + $0x70] sm:$0xff] %v922_v7 }
 0x330 PF: > { %p1250_p3 = scmp.eq.s32.totalorder %s1645_s24, 7  ;;  %s1583_s21 = smov [#allocation11]  }
 0x331   : > { %s949_s25 = sshll.u32 %s1583_s21, 4  ;;  %s950_s25 = int_to_ptr.vmem [resolvable:$true] %s949_s25 }
 0x332   : > { %s1474_s13 = scalar_lea.vmem %s950_s25, 2048  ;;  %p1481_p12 = scmp.lt.s32.totalorder %s950_s25, %s950_s25 }
 0x333   : > { %p1475_p5 = scmp.ne.s32.totalorder %s950_s25, %s1474_s13  ;;  %p1482_p11 = scmp.lt.s32.totalorder %s1474_s13, %s1474_s13 }
 0x335   : > { %p1476_p8 = pnand %p1475_p5, %p1250_p3  ;;  %p1483_p13 = por %p1482_p11, %p1481_p12 }
 0x337   : > { %p1477_p10 = pneg %p1476_p8 }
 0x339   : > { %p1484_p0 = pnand %p1483_p13, %p1477_p10 }
 0x33b   : > { %1487 = shalt.err (!%p1484_p0)
}
 0x33c   : > { %s1488_s11 = scalar_lea.hbm %s1940_s5, 2048 }
 0x33d   : > { %p1489_p7 = scmp.ne.s32.totalorder %s1940_s5, %s1488_s11  ;;  %p1494_p1 = scmp.lt.u32.totalorder %s1488_s11, %s1940_s5 }
 0x33f   : > { %p1490_p2 = pnand %p1489_p7, %p1250_p3 }
 0x341   : > { %p1491_p6 = pneg %p1490_p2 }
 0x343   : > { %p1496_p4 = pnand %p1494_p1, %p1491_p6 }
 0x345   : > { %1499 = shalt.err (!%p1496_p4)
}
 0x346   : > { %s1584_s14 = smov 128   ;;  %s1585_s10 = smov 8  }
 0x347   : > { %1223 = dma.vmem_to_hbm [thread:$0]  (%p1250_p3), %s950_s25, 2048, %s1940_s5, [#allocation4], %s1584_s14, %s1584_s14, %s1585_s10  }
 0x348   : > { %1545 = dma.done.wait (%p1250_p3), [#allocation4], 2048  }
 0x349   : > { %1547 = vsyncadd (%p1250_p3), [#allocation4], 4294965248 }
 0x34a PF: > { %s1982_s16 = sld [smem:[#allocation19_spill]]  ;;  %s1983_s15 = sld [smem:[#allocation18_spill]] }
 0x34b   : > { %s1984_s20 = sld [smem:[#allocation21_spill]]  ;;  %s1985_s0 = sld [smem:[#allocation20_spill]] }
 0x34c   : > { %s1986_s18 = smov %s1554_s19  ;;  %s1988_s21 = smov %s1566_s22 }
 0x350   : > { %s21_s23 = sadd.s32 1, %s1982_s16   ;;  %s1987_s19 = smov %s1983_s15 }
 0x351   : > { %p18_p9 = scmp.ge.s32.totalorder %s21_s23, 10   ;;  %s1989_s22 = smov %s1985_s0 }
 0x353   :  { %20 = sbr.rel (!%p18_p9) target bundleno = 10 (0xa), region = 110 }
 0x35a   :  { %965 = vsyncpa [#allocation3], 1 }
 0x35b   :  { %967 = vsyncpa [#allocation3 + $0x1], 1 }
 0x35c   :  { %968 = vsyncpa [#allocation6], 1 }
 0x35d   :  { %969 = vsyncpa [#allocation10], 1 }
 0x35e   :  { %970 = vsyncpa [#allocation4], 1 }
 0x35f   :  { %972 = vsyncpa [#allocation4 + $0x1], 1 }

</bundles_post_ra>
